<compile_context>
chip_gen: v7x
topology: tpu7x:2x2x1
jax: 0.10.0
libtpu: 0.0.40
codegen_flags: <defaults>
</compile_context>

<pallas_src>
import jax
import jax.numpy as jnp
from jax.experimental import pallas as pl
from jax.experimental.pallas import tpu as pltpu


# ----------------------------------------------------------------------------- kernel ---
def _position_cosine_kernel(tbl_ref, ids_ref, qry_ref, sim_ref):
    """One tile of TB batch elements per grid step.

    tbl_ref : VMEM bf16 [E, V]         embedding table, pre-transposed; same block every
                                       step -> fetched from HBM only once.
    ids_ref : VMEM i32  [TB, C, Q, 1]  UNK-clamped source token ids.
    qry_ref : VMEM bf16 [TB, Q, E]     query embeddings, padded positions already zeroed.
    sim_ref : VMEM f32  [TB, 1, C]     softmax similarities over the C context docs.
    """
    tbl = tbl_ref[...]                                            # (E, V)  bf16
    ids = ids_ref[...]                                            # (TB, C, Q, 1) i32
    qry = qry_ref[...]                                            # (TB, Q, E) bf16
    tb, c, q, _ = ids.shape
    e, v = tbl.shape

    # (1) Query-vs-vocab scores on the MXU: qdote[b,q,v] = <qry[b,q,:], emb[v,:]>.
    qdote = jnp.dot(qry.reshape(tb * q, e), tbl,
                    preferred_element_type=jnp.float32)           # (TB*Q, V) f32
    qdote = qdote.reshape(tb, 1, q, v)                            # broadcastable over C

    # (2) Fused source-embedding gather: one-hot select of qdote rows by source token id,
    #     reduced over (q, v):  score[b,c] = sum_q qdote[b, q, ids[b,c,q]]
    #     == the reference's (emb[src] * emb[qry]).sum(E).sum(Q).
    hit = ids == jax.lax.broadcasted_iota(jnp.int32, (tb, c, q, v), 3)
    contrib = jnp.where(hit, qdote, 0.0)                          # (TB, C, Q, V) f32
    scores = jnp.sum(jnp.sum(contrib, axis=3), axis=2)            # (TB, C) f32

    # (3) Softmax over the context axis (f32); reciprocal on the EUP.
    m = jnp.max(scores, axis=-1, keepdims=True)
    ex = jnp.exp(scores - m)
    denom = jnp.sum(ex, axis=-1, keepdims=True)
    sim = ex * pl.reciprocal(denom, approx=True)                  # (TB, C)
    sim_ref[...] = sim.reshape(tb, 1, c)


# ----------------------------------------------------------------- tiling / budgeting ---
def _round_up(x, m):
    return -(-x // m) * m


def _tile_vmem_bytes(tb, c, q, v, e):
    """Padding-aware ((sublane, lane)-rounded) VMEM estimate for one grid step."""
    lanes = 128
    ids_b = tb * c * _round_up(q, 8) * lanes * 4                       # (TB,C,Q,1) i32
    qry_b = tb * _round_up(q, 16) * _round_up(e, lanes) * 2            # (TB,Q,E) bf16
    out_b = tb * 8 * _round_up(c, lanes) * 4                           # (TB,1,C) f32
    tbl_b = _round_up(e, 16) * _round_up(v, lanes) * 2                 # (E,V)    bf16
    qdote_b = _round_up(tb * q, 8) * _round_up(v, lanes) * 4           # (TB*Q,V) f32
    onehot_b = 2 * tb * c * _round_up(q, 8) * _round_up(v, lanes) * 4  # hit + contrib
    # inputs/outputs double-buffered by the pipeline; intermediates single-buffered.
    return 2 * (ids_b + qry_b + out_b + tbl_b) + qdote_b + onehot_b


def _pick_batch_tile(batch, c, q, v, e, *, tile_budget, prefer_two_blocks):
    """Largest batch tile TB whose working set fits `tile_budget`.  Only on 2-TC parts
    (v7x) do we also insist on >= 2 grid blocks so both TensorCores get work."""
    best = 1
    for tb in range(1, batch + 1):
        if _tile_vmem_bytes(tb, c, q, v, e) > tile_budget:
            break
        if prefer_two_blocks and batch >= 2 and pl.cdiv(batch, tb) < 2:
            continue
        best = tb
    return best


def _device_kind():
    try:
        return jax.devices()[0].device_kind.lower()
    except Exception:
        return ""


# ---------------------------------------------------------------------------- wrapper ---
def position_cosine_forward(sources, queries, embedding, unk_id):
    """
    sources  : int32 [B*C, S]  token ids (all batch elements share context length C)
    queries  : int32 [B, Q]    token ids (0 = trailing padding)
    embedding: f32   [V, E]    embedding table
    Returns (best_sources [B, S] int32, similarities [B, C] float32).
    """
    vocab_count, embed = embedding.shape
    B, Q = queries.shape
    BC, S = sources.shape
    C = BC // B
    assert BC == B * C, "sources rows must be batch * context"
    assert S >= Q, "source sequence must be at least as long as query sequence"

    emb_bf16 = embedding.astype(jnp.bfloat16)
    tbl_t = emb_bf16.T                                             # (E, V) bf16

    # UNK clamp (reference's unk_tensor) on the raw int32 ids.
    src_ids = sources[:, :Q]
    src_ids = jnp.where(src_ids >= vocab_count, unk_id, src_ids).astype(jnp.int32)
    qry_ids = jnp.where(queries >= vocab_count, unk_id, queries).astype(jnp.int32)

    # Tiny query gather stays in XLA; zero the padded query positions here (replaces the
    # qlim input + in-kernel mask of v2).  Trailing padding makes this equivalent to the
    # reference's [:q_len] slice of both query and source.
    q_valid = (queries > 0).astype(jnp.bfloat16)[:, :, None]      # (B, Q, 1)
    emb_qry = emb_bf16[qry_ids] * q_valid                         # (B, Q, E) bf16

    ids4 = src_ids.reshape(B, C, Q)[..., None]                    # (B, C, Q, 1) int32

    # Generation-aware batch tiling.
    kind = _device_kind()
    two_tc = ("v7" in kind) or ("7x" in kind)                     # v7x: 2 TensorCores
    tile_budget = (8 if two_tc else 12) * 1024 * 1024
    TB = _pick_batch_tile(B, C, Q, vocab_count, embed,
                          tile_budget=tile_budget, prefer_two_blocks=two_tc)
    n_blocks = pl.cdiv(B, TB)
    B_pad = n_blocks * TB
    if B_pad != B:  # awkward B: pad with zero rows instead of collapsing TB to 1
        pad = B_pad - B
        ids4 = jnp.pad(ids4, ((0, pad), (0, 0), (0, 0), (0, 0)))
        emb_qry = jnp.pad(emb_qry, ((0, pad), (0, 0), (0, 0)))

    tile_bytes = _tile_vmem_bytes(TB, C, Q, vocab_count, embed)
    # 48 MiB cap keeps headroom on v7x's 64 MiB physical VMEM; plenty on v5e/v6e.
    vmem_limit = int(min(48 * 1024 * 1024, max(32 * 1024 * 1024, 2 * tile_bytes)))

    sim = pl.pallas_call(
        _position_cosine_kernel,
        out_shape=jax.ShapeDtypeStruct((B_pad, 1, C), jnp.float32),
        grid_spec=pltpu.PrefetchScalarGridSpec(
            num_scalar_prefetch=0,
            grid=(n_blocks,),
            in_specs=[
                pl.BlockSpec((embed, vocab_count), lambda i: (0, 0)),   # table: same block
                pl.BlockSpec((TB, C, Q, 1), lambda i: (i, 0, 0, 0)),    # source ids
                pl.BlockSpec((TB, Q, embed), lambda i: (i, 0, 0)),      # masked queries
            ],
            out_specs=pl.BlockSpec((TB, 1, C), lambda i: (i, 0, 0)),
        ),
        compiler_params=pltpu.CompilerParams(
            dimension_semantics=("parallel",),
            vmem_limit_bytes=vmem_limit,
        ),
    )(tbl_t, ids4, emb_qry)
    sim = sim[:B, 0, :]                                            # (B, C)

    # argmax over context + gather of the winning raw source row (pure index glue).
    top = jnp.argmax(sim, axis=1)
    row_idx = jnp.arange(B, dtype=jnp.int32) * C + top.astype(jnp.int32)
    best_sources = sources[row_idx]                                # (B, S)
    return best_sources, sim


# ------------------------------------------------------------------ pure-JAX reference ---
def _reference_forward(sources, queries, embedding, unk_id):
    """Pure-JAX reference (same bf16 rounding of the table as the kernel path)."""
    vocab_count, embed = embedding.shape
    B, Q = queries.shape
    BC, _ = sources.shape
    C = BC // B
    emb = embedding.astype(jnp.bfloat16).astype(jnp.float32)
    src_ids = jnp.where(sources[:, :Q] >= vocab_count, unk_id, sources[:, :Q])
    qry_ids = jnp.where(queries >= vocab_count, unk_id, queries)
    e_src = emb[src_ids].reshape(B, C, Q, embed)                   # (B, C, Q, E)
    e_qry = emb[qry_ids] * (queries > 0).astype(jnp.float32)[:, :, None]
    scores = jnp.einsum("bcqe,bqe->bc", e_src, e_qry)
    sim = jax.nn.softmax(scores, axis=-1)
    top = jnp.argmax(sim, axis=1)
    best = sources[jnp.arange(B) * C + top]
    return best, sim


# ------------------------------------------------------------------------------- main ---
if __name__ == "__main__":
    # Small, deterministic shapes: batch=2, context-per-batch=4, src_seq=8, qry_seq=8, embed=32
    B, C, S, Q, E = 2, 4, 8, 8, 32
    vocab_count = 50
    unk_id = 1

    key = jax.random.PRNGKey(0)
    k_emb, k_src, k_qry = jax.random.split(key, 3)

    embedding = 0.1 * jax.random.normal(k_emb, (vocab_count, E), dtype=jnp.float32)
    sources = jax.random.randint(k_src, (B * C, S), 1, vocab_count, dtype=jnp.int32)
    queries = jax.random.randint(k_qry, (B, Q), 1, vocab_count, dtype=jnp.int32)
    # exercise the <UNK> clamp and trailing query padding (token id 0 => q_len = Q-2)
    sources = sources.at[0, 0].set(vocab_count + 7)
    queries = queries.at[:, Q - 2:].set(0)

    best_sources, similarities = position_cosine_forward(sources, queries, embedding, unk_id)
    jax.block_until_ready((best_sources, similarities))

    ref_best, ref_sim = _reference_forward(sources, queries, embedding, unk_id)

    assert best_sources.shape == (B, S)
    assert similarities.shape == (B, C)
    assert bool(jnp.all(jnp.isfinite(similarities)))
    # softmax rows sum to ~1 (approx reciprocal => loose-ish tol)
    assert bool(jnp.allclose(jnp.sum(similarities, axis=1), 1.0, atol=1e-2))
    # match the pure-JAX reference
    assert bool(jnp.allclose(similarities, ref_sim, atol=1e-2, rtol=1e-2))
    assert bool(jnp.array_equal(best_sources, ref_best))
    print("KERNEL_OK")
</pallas_src>

<mosaic_0001>
module attributes {stable_mosaic.version = 11 : i64} {
  func.func @_position_cosine_kernel(%arg0: i32, %arg1: memref<32x50xbf16, #tpu.memory_space<vmem>>, %arg2: memref<2x4x8x1xi32, #tpu.memory_space<vmem>>, %arg3: memref<2x8x32xbf16, #tpu.memory_space<vmem>>, %arg4: memref<2x1x4xf32, #tpu.memory_space<vmem>>) attributes {dimension_semantics = [#tpu.dimension_semantics<parallel>], iteration_bounds = array<i64: 1>, scalar_prefetch = 0 : i64, scratch_operands = 0 : i64, tpu.core_type = #tpu.core_type<tc>, window_params = [{pipeline_mode = #tpu.pipeline_mode<synchronous>, transform_indices = @transform_0, window_bounds = array<i64: 32, 50>}, {transform_indices = @transform_1, window_bounds = array<i64: 2, 4, 8, 1>}, {transform_indices = @transform_2, window_bounds = array<i64: 2, 8, 32>}, {transform_indices = @transform_3, window_bounds = array<i64: 2, 1, 4>}]} {
    %c0 = arith.constant 0 : index
    %c0_0 = arith.constant 0 : index
    %0 = vector.load %arg1[%c0, %c0_0] : memref<32x50xbf16, #tpu.memory_space<vmem>>, vector<32x50xbf16>
    %c0_1 = arith.constant 0 : index
    %c0_2 = arith.constant 0 : index
    %c0_3 = arith.constant 0 : index
    %c0_4 = arith.constant 0 : index
    %1 = vector.load %arg2[%c0_1, %c0_2, %c0_3, %c0_4] : memref<2x4x8x1xi32, #tpu.memory_space<vmem>>, vector<2x4x8x1xi32>
    %c0_5 = arith.constant 0 : index
    %c0_6 = arith.constant 0 : index
    %c0_7 = arith.constant 0 : index
    %2 = vector.load %arg3[%c0_5, %c0_6, %c0_7] : memref<2x8x32xbf16, #tpu.memory_space<vmem>>, vector<2x8x32xbf16>
    %3 = vector.shape_cast %2 : vector<2x8x32xbf16> to vector<16x32xbf16>
    %cst = arith.constant dense<0.000000e+00> : vector<16x50xf32>
    %4 = tpu.matmul %3, %0, %cst {dimension_numbers = #tpu.dot_dimension_numbers<[1], [0], [0], [1], [0, 0, 1, 1], [], []>} : vector<16x32xbf16>, vector<32x50xbf16>, vector<16x50xf32> -> vector<16x50xf32>
    %5 = vector.shape_cast %4 : vector<16x50xf32> to vector<2x1x8x50xf32>
    %6 = tpu.iota {dimensions = array<i32: 3>} : vector<2x4x8x50xi32>
    %7 = vector.broadcast %1 : vector<2x4x8x1xi32> to vector<2x4x8x50xi32>
    %8 = arith.cmpi eq, %7, %6 : vector<2x4x8x50xi32>
    %cst_8 = arith.constant 0.000000e+00 : f32
    %9 = vector.shape_cast %5 : vector<2x1x8x50xf32> to vector<2x1x8x50xf32>
    %10 = vector.broadcast %9 : vector<2x1x8x50xf32> to vector<2x4x8x50xf32>
    %11 = vector.broadcast %cst_8 : f32 to vector<2x4x8x50xf32>
    %12 = arith.select %8, %10, %11 : vector<2x4x8x50xi1>, vector<2x4x8x50xf32>
    %cst_9 = arith.constant dense<0.000000e+00> : vector<2x4x8xf32>
    %13 = vector.multi_reduction <add>, %12, %cst_9 [3] : vector<2x4x8x50xf32> to vector<2x4x8xf32>
    %cst_10 = arith.constant dense<0.000000e+00> : vector<2x4xf32>
    %14 = vector.multi_reduction <add>, %13, %cst_10 [2] : vector<2x4x8xf32> to vector<2x4xf32>
    %cst_11 = arith.constant dense<0xFF800000> : vector<2xf32>
    %15 = vector.multi_reduction <maximumf>, %14, %cst_11 [1] : vector<2x4xf32> to vector<2xf32>
    %16 = vector.shape_cast %15 : vector<2xf32> to vector<2x1xf32>
    %17 = vector.broadcast %16 : vector<2x1xf32> to vector<2x4xf32>
    %18 = arith.subf %14, %17 : vector<2x4xf32>
    %19 = math.exp %18 : vector<2x4xf32>
    %cst_12 = arith.constant dense<0.000000e+00> : vector<2xf32>
    %20 = vector.multi_reduction <add>, %19, %cst_12 [1] : vector<2x4xf32> to vector<2xf32>
    %21 = vector.shape_cast %20 : vector<2xf32> to vector<2x1xf32>
    %22 = tpu.reciprocal %21 {approx = true} : vector<2x1xf32> -> vector<2x1xf32>
    %23 = vector.broadcast %22 : vector<2x1xf32> to vector<2x4xf32>
    %24 = arith.mulf %19, %23 : vector<2x4xf32>
    %25 = vector.shape_cast %24 : vector<2x4xf32> to vector<2x1x4xf32>
    %c0_13 = arith.constant 0 : index
    %c0_14 = arith.constant 0 : index
    %c0_15 = arith.constant 0 : index
    %26 = vector.load %arg4[%c0_13, %c0_14, %c0_15] : memref<2x1x4xf32, #tpu.memory_space<vmem>>, vector<2x1x4xf32>
    tpu.vector_store %arg4[%c0_13, %c0_14, %c0_15], %25 {strides = array<i32>} : memref<2x1x4xf32, #tpu.memory_space<vmem>>, vector<2x1x4xf32>,
    return
  }
  func.func @transform_0(%arg0: i32) -> (i32, i32) {
    %c0_i32 = arith.constant 0 : i32
    %c0_i32_0 = arith.constant 0 : i32
    %c0_i32_1 = arith.constant 0 : i32
    return %c0_i32, %c0_i32_0 : i32, i32
  }
  func.func @transform_1(%arg0: i32) -> (i32, i32, i32, i32) {
    %c0_i32 = arith.constant 0 : i32
    %c0_i32_0 = arith.constant 0 : i32
    %c0_i32_1 = arith.constant 0 : i32
    %c0_i32_2 = arith.constant 0 : i32
    return %arg0, %c0_i32, %c0_i32_0, %c0_i32_1 : i32, i32, i32, i32
  }
  func.func @transform_2(%arg0: i32) -> (i32, i32, i32) {
    %c0_i32 = arith.constant 0 : i32
    %c0_i32_0 = arith.constant 0 : i32
    %c0_i32_1 = arith.constant 0 : i32
    return %arg0, %c0_i32, %c0_i32_0 : i32, i32, i32
  }
  func.func @transform_3(%arg0: i32) -> (i32, i32, i32) {
    %c0_i32 = arith.constant 0 : i32
    %c0_i32_0 = arith.constant 0 : i32
    %c0_i32_1 = arith.constant 0 : i32
    return %arg0, %c0_i32, %c0_i32_0 : i32, i32, i32
  }
}

</mosaic_0001>

<bundles_post_ra>
// kernel: tpu_custom_call.1
= control target key start
LH: loop header
LB: loop body
LE: loop exit
PB: predicated region body
PF: predicated region fallthrough
CT: control target
= control target key end

     0   :  { %v378_v1 = vmov 0.0   ;;  %vm379_vm0 = vmmov 0   ;;  %v380_v5 = vmov 0   ;;  %s488_s0 = inlined_call_operand.vmem [shape: bf16[32,50], index: 0, kind: input, shape index: {}]   ;;  %s489_s1 = inlined_call_operand.vmem [shape: s32[2,4,8,1], index: 1, kind: input, shape index: {}]   ;;  %s490_s2 = inlined_call_operand.vmem [shape: bf16[2,8,32], index: 2, kind: input, shape index: {}]   ;;  %s491_s3 = inlined_call_operand.hbm [shape: f32[2,1,4], index: 3, kind: output, shape index: {}]  }
   0x1   :  { %v345_v0 = vld [vmem:[%s488_s0] sm:$0xff]   ;;  %329 = vmatprep.subr.bf16.mxu0 %v378_v1  ;;  %v346_v2 = vld [vmem:[%s488_s0 + $0x8] sm:$0xff]   ;;  %333 = vmatprep.mubr.msk.bf16.mxu0 %vm379_vm0, %v378_v1 }
   0x2   :  { %330 = vmatpush3.bf16.msra.mxu0 %v345_v0  ;;  %v20_v3 = vld [vmem:[%s489_s1] sm:$0xff]  ;;  %343 = vset.pattern.permute.xlu0 %v380_v5 }
   0x3   :  { %331 = vmatprep.subr.bf16.mxu0 %v378_v1  ;;  %v24_v4 = vld [vmem:[%s489_s1 + $0x20] sm:$0xff]  ;;  %344 = vset.pattern.permute.xlu1 %v380_v5 }
   0x4   :  { %v347_v6 = vld [vmem:[%s490_s2] sm:$0xff]   ;;  %95 = vperm.xlu0 %343, %v20_v3   ;;  %107 = vperm.xlu1 %344, %v24_v4  }
   0x5   :  { %8 = vsyncpa [#allocation3], 0  ;;  %vm47_vm1 = vcmask 261120   ;;  %v21_v7 = vld [vmem:[%s489_s1 + $0x8] sm:$0xff]  ;;  %v22_v9 = vld [vmem:[%s489_s1 + $0x10] sm:$0xff]  ;;  %v92_v15 = vlaneseq  ;;  %vm134_vm4 = vcmask 408576  }
   0x6   :  { %332 = vmatpush3.bf16.msra.mxu0 %v346_v2  ;;  %v25_v8 = vld [vmem:[%s489_s1 + $0x28] sm:$0xff]  ;;  %v26_v10 = vld [vmem:[%s489_s1 + $0x30] sm:$0xff]  ;;  %v23_v11 = vld [vmem:[%s489_s1 + $0x18] sm:$0xff]  ;;  %vm199_vm11 = vcmask 1041409   ;;  %vm201_vm12 = vcmask 1042434   ;;  %vm203_vm13 = vcmask 1043459  }
   0x7   :  { %v27_v12 = vld [vmem:[%s489_s1 + $0x38] sm:$0xff]  ;;  %v93_v17 = vand.u32 127, %v92_v15  ;;  %v445_v43 = vshrl.u32 %v92_v15, 7  ;;  %vm210_vm14 = vcmask 60416   ;;  %vm229_vm15 = vcmask 25600   ;;  %s381_s1 = smov [#allocation2]  }
   0x8   :  { %98 = vperm.xlu0 %343, %v21_v7   ;;  %110 = vperm.xlu1 %344, %v25_v8   ;;  %vm303_vm0 = vcmask 24576   ;;  %s311_s5 = sshll.u32 %s381_s1, 4  ;;  %s312_s5 = int_to_ptr.vmem [resolvable:$true] %s311_s5 }
   0x9   :  { %334 = vmatmul.mubr.msk.bf16.vlgmr.msra.gmra.mrb[0].mxu0 %vm47_vm1, %v347_v6  ;;  %v448_v46 = vsub.s32 %v93_v17, %v445_v43  ;;  %s354_s6 = scalar_lea.vmem %s312_s5, 32  ;;  %p359_p1 = scmp.lt.s32.totalorder %s312_s5, %s312_s5 }
   0xa   :  { %p355_p0 = scmp.ne.s32.totalorder %s312_s5, %s354_s6  ;;  %p360_p2 = scmp.lt.s32.totalorder %s354_s6, %s354_s6 }
   0xc   :  { %101 = vperm.xlu0 %343, %v22_v9   ;;  %113 = vperm.xlu1 %344, %v26_v10   ;;  %p361_p3 = por %p360_p2, %p359_p1 }
   0xe   :  { %p362_p4 = pnand %p361_p3, %p355_p0 }
  0x10   :  { %104 = vperm.xlu0 %343, %v23_v11   ;;  %116 = vperm.xlu1 %344, %v27_v12   ;;  %v236_v11 = vsub.s32 0, %v445_v43  ;;  %v240_v12 = vsub.s32 1, %v445_v43 }
  0x83   :  { %v96_v13 = vpop.permute.xlu0 %95  ;;  %v108_v16 = vpop.permute.xlu1 %107 }
  0x84   :  { %vm118_vm2 = vcmp.eq.s32.totalorder %v96_v13, %v93_v17  ;;  %vm122_vm5 = vcmp.eq.s32.totalorder %v108_v16, %v93_v17 }
  0x87   :  { %v99_v14 = vpop.permute.xlu0 %98  ;;  %v111_v19 = vpop.permute.xlu1 %110 }
  0x88   :  { %vm119_vm3 = vcmp.eq.s32.totalorder %v99_v14, %v93_v17  ;;  %vm123_vm7 = vcmp.eq.s32.totalorder %v111_v19, %v93_v17 }
  0x8b   :  { %v102_v18 = vpop.permute.xlu0 %101  ;;  %v114_v28 = vpop.permute.xlu1 %113 }
  0x8c   :  { %vm120_vm6 = vcmp.eq.s32.totalorder %v102_v18, %v93_v17  ;;  %vm124_vm9 = vcmp.eq.s32.totalorder %v114_v28, %v93_v17 }
  0x8f   :  { %v105_v21 = vpop.permute.xlu0 %104  ;;  %v117_v36 = vpop.permute.xlu1 %116 }
  0x90   :  { %vm121_vm8 = vcmp.eq.s32.totalorder %v105_v21, %v93_v17  ;;  %vm125_vm10 = vcmp.eq.s32.totalorder %v117_v36, %v93_v17 }
  0xdc   :  { %v85_v20 = vpop.f32.mrb[0].mxu0 }
  0xdd   :  { %v335_v22 = vpop.f32.mrb[1].mxu0  ;;  %v127_v23 = vsel %vm119_vm3, %v85_v20, 0.0  ;;  %v126_v24 = vsel %vm118_vm2, %v85_v20, 0.0  ;;  %v128_v30 = vsel %vm120_vm6, %v85_v20, 0.0  ;;  %v129_v34 = vsel %vm121_vm8, %v85_v20, 0.0 }
  0xde   :  { %v88_v25 = vpop.f32.mrb[2].mxu0  ;;  %v138_v26 = vsel %vm134_vm4, %v127_v23, 0.0  ;;  %v135_v27 = vsel %vm134_vm4, %v126_v24, 0.0  ;;  %v141_v32 = vsel %vm134_vm4, %v128_v30, 0.0  ;;  %v144_v37 = vsel %vm134_vm4, %v129_v34, 0.0 }
  0xdf   :  { %139 = vadd.xlane.f32.xlu1 %v138_v26  ;;  %136 = vadd.xlane.f32.xlu0 %v135_v27  ;;  %v336_v29 = vpop.f32.mrb[3].mxu0  ;;  %v130_v31 = vsel %vm122_vm5, %v88_v25, 0.0  ;;  %v131_v35 = vsel %vm123_vm7, %v88_v25, 0.0  ;;  %v132_v39 = vsel %vm124_vm9, %v88_v25, 0.0  ;;  %v133_v41 = vsel %vm125_vm10, %v88_v25, 0.0 }
  0xe0   :  { %v147_v33 = vsel %vm134_vm4, %v130_v31, 0.0  ;;  %v150_v38 = vsel %vm134_vm4, %v131_v35, 0.0  ;;  %v153_v40 = vsel %vm134_vm4, %v132_v39, 0.0  ;;  %v156_v42 = vsel %vm134_vm4, %v133_v41, 0.0 }
  0xe3   :  { %142 = vadd.xlane.f32.xlu1 %v141_v32  ;;  %148 = vadd.xlane.f32.xlu0 %v147_v33 }
  0xe7   :  { %145 = vadd.xlane.f32.xlu1 %v144_v37  ;;  %151 = vadd.xlane.f32.xlu0 %v150_v38 }
  0xeb   :  { %154 = vadd.xlane.f32.xlu0 %v153_v40 }
  0xef   :  { %157 = vadd.xlane.f32.xlu0 %v156_v42 }
 0x16c   :  { %v140_v44 = vpop.xlane.xlu1 %139  ;;  %v137_v45 = vpop.xlane.xlu0 %136 }
 0x16d   :  { %v174_v49 = vrot.slane %v140_v44, %v448_v46  ;;  %v170_v50 = vrot.slane %v137_v45, %v448_v46 }
 0x16f   :  { %v200_v54 = vsel %vm199_vm11, %v174_v49, %v170_v50 }
 0x170   :  { %v143_v47 = vpop.xlane.xlu1 %142  ;;  %v149_v48 = vpop.xlane.xlu0 %148 }
 0x171   :  { %v178_v51 = vrot.slane %v143_v47, %v448_v46  ;;  %v186_v62 = vrot.slane %v149_v48, %v448_v46 }
 0x173   :  { %v202_v56 = vsel %vm201_vm12, %v178_v51, %v200_v54 }
 0x174   :  { %v146_v52 = vpop.xlane.xlu1 %145  ;;  %v152_v53 = vpop.xlane.xlu0 %151 }
 0x175   :  { %v182_v55 = vrot.slane %v146_v52, %v448_v46  ;;  %v190_v60 = vrot.slane %v152_v53, %v448_v46 }
 0x177   :  { %v204_v57 = vsel %vm203_vm13, %v182_v55, %v202_v56  ;;  %v205_v0 = vsel %vm199_vm11, %v190_v60, %v186_v62 }
 0x178   :  { %v155_v58 = vpop.xlane.xlu0 %154  ;;  %v211_v59 = vsel %vm210_vm14, %v204_v57, 0.0 }
 0x179   :  { %212 = vadd.xlane.f32.xlu1 %v211_v59  ;;  %v194_v61 = vrot.slane %v155_v58, %v448_v46 }
 0x17b   :  { %v206_v2 = vsel %vm201_vm12, %v194_v61, %v205_v0 }
 0x17c   :  { %v158_v63 = vpop.xlane.xlu0 %157 }
 0x17d   :  { %v198_v1 = vrot.slane %v158_v63, %v448_v46 }
 0x17f   :  { %v207_v3 = vsel %vm203_vm13, %v198_v1, %v206_v2 }
 0x180   :  { %v214_v4 = vsel %vm210_vm14, %v207_v3, 0.0 }
 0x181   :  { %215 = vadd.xlane.f32.xlu0 %v214_v4 }
 0x206   :  { %v213_v5 = vpop.xlane.xlu1 %212 }
 0x207   :  { %v222_v7 = vrot.slane %v213_v5, %v448_v46 }
 0x20e   :  { %v216_v6 = vpop.xlane.xlu0 %215 }
 0x20f   :  { %v226_v8 = vrot.slane %v216_v6, %v448_v46 }
 0x211   :  { %v227_v9 = vsel %vm199_vm11, %v226_v8, %v222_v7 }
 0x212   :  { %v230_v10 = vsel %vm229_vm15, %v227_v9, -inf }
 0x213   :  { %231 = vmax.xlane.f32.xlu1 %v230_v10 }
 0x2a0   :  { %v232_v13 = vpop.xlane.xlu1 %231 }
 0x2a1   :  { %v237_v14 = vrot.slane %v232_v13, %v236_v11  ;;  %v241_v15 = vrot.slane %v232_v13, %v240_v12 }
 0x2a3   :  { %v244_v16 = vsub.f32 %v213_v5, %v237_v14  ;;  %v245_v17 = vsub.f32 %v216_v6, %v241_v15 }
 0x2a5   :  { %v246_v18 = vmul.f32 1.442695, %v244_v16  ;;  %v248_v19 = vmul.f32 1.442695, %v245_v17 }
 0x2a7   :  { %348 = vpow2.f32 %v246_v18 }
 0x2a8   :  { %350 = vpow2.f32 %v248_v19 }
 0x2b1   :  { %v349_v20 = vpop.eup %348 }
 0x2b2   :  { %v351_v21 = vpop.eup %350  ;;  %253 = vperm.xlu0 %343, %v349_v20  }
 0x2b3   :  { %256 = vperm.xlu1 %344, %v351_v21  }
 0x331   :  { %v254_v22 = vpop.permute.xlu0 %253 }
 0x332   :  { %v257_v23 = vpop.permute.xlu1 %256  ;;  %v261_v24 = vrot.slane %v254_v22, %v448_v46 }
 0x333   :  { %v265_v25 = vrot.slane %v257_v23, %v448_v46 }
 0x335   :  { %v266_v26 = vsel %vm199_vm11, %v265_v25, %v261_v24 }
 0x336   :  { %v268_v27 = vsel %vm229_vm15, %v266_v26, 0.0 }
 0x337   :  { %269 = vadd.xlane.f32.xlu1 %v268_v27 }
 0x3c4   :  { %v270_v28 = vpop.xlane.xlu1 %269 }
 0x3c5   :  { %352 = vrcp.f32 %v270_v28 }
 0x3cf   :  { %v353_v29 = vpop.eup %352 }
 0x3d0   :  { %v276_v30 = vrot.slane %v353_v29, %v236_v11  ;;  %v280_v32 = vrot.slane %v353_v29, %v240_v12 }
 0x3d2   :  { %v283_v31 = vmul.f32 %v349_v20, %v276_v30  ;;  %v284_v33 = vmul.f32 %v351_v21, %v280_v32 }
 0x3d4   :  { %288 = vperm.xlu0 %343, %v283_v31  }
 0x3d8   :  { %291 = vperm.xlu0 %343, %v284_v33  }
 0x453   :  { %v289_v34 = vpop.permute.xlu0 %288 }
 0x454   :  { %v296_v35 = vrot.slane %v289_v34, %v448_v46 }
 0x456   :  { %304 = vst.msk [vmem:[#allocation2] sm:$0x1] %vm303_vm0, %v296_v35 }
 0x457   :  { %v292_v36 = vpop.permute.xlu0 %291 }
 0x458   :  { %v300_v37 = vrot.slane %v292_v36, %v448_v46 }
 0x45a   :  { %305 = vst.msk [vmem:[#allocation2 + $0x1] sm:$0x1] %vm303_vm0, %v300_v37 }
 0x45b   :  { %365 = shalt.err (!%p362_p4)
}
 0x45c   :  { %s366_s9 = scalar_lea.hbm %s491_s3, 32 }
 0x45d   :  { %p367_p5 = scmp.ne.s32.totalorder %s491_s3, %s366_s9  ;;  %p370_p6 = scmp.lt.u32.totalorder %s366_s9, %s491_s3 }
 0x45f   :  { %p372_p7 = pnand %p370_p6, %p367_p5 }
 0x461   :  { %375 = shalt.err (!%p372_p7)
}
 0x462   :  { %s382_s14 = smov 16   ;;  %s383_s15 = smov 1  }
 0x463   :  { %317 = dma.vmem_to_hbm [thread:$0]  %s312_s5, 32, %s491_s3, [#allocation3], %s382_s14, %s382_s14, %s383_s15  }
 0x464   :  { %376 = dma.done.wait [#allocation3], 32  }
 0x465   :  { %377 = vsyncadd [#allocation3], 4294967264 }
 0x466   :  { %321 = vsyncpa [#allocation3], 1 }

</bundles_post_ra>
